<compile_context>
chip_gen: v5e
topology: v5e:2x2
jax: 0.10.0
libtpu: 0.0.40
codegen_flags: <defaults>
</compile_context>

<pallas_src>
import jax
import jax.numpy as jnp
from jax import lax
from jax.experimental import pallas as pl
from jax.experimental.pallas import tpu as pltpu


def _round_up(x, m):
    return (x + m - 1) // m * m


def _botblock_kernel(patches_ref, p_ref, scale_ref, w3_ref, o_ref):
    """One grid step = (batch element b, pixel tile m).

    patches_ref : (1, Kp, TILE_M)  bf16  im2col taps of N (tap on sublane, pixel on lane)
    p_ref       : (1, Cp, TILE_M)  bf16  lateral feature P
    scale_ref   : (1, Cp, 1)       f32   per-batch (1 + channel_attention) scale
    w3_ref      : (Cp, Kp)         bf16  conv3x3 weight flattened over (c_in, ky, kx)
    o_ref       : (1, Cp, TILE_M)  f32   output tile (lane-dense along M)
    """
    # conv3x3 / stride 2 == matmul over the (c_in, ky, kx) tap axis (MXU, f32 accumulate).
    x = jnp.dot(w3_ref[...], patches_ref[0],
                preferred_element_type=jnp.float32)            # (Cp, TILE_M)
    out = x + p_ref[0].astype(jnp.float32)                     # conv3x3(N) + P
    # ca_out = ca*out + out == (1 + ca) * out ; SA branch is the identity (elided).
    o_ref[0] = (scale_ref[0] * out).astype(o_ref.dtype)


@jax.jit
def botblock_ca_sa2(n_x, p_x, w_conv3, w_ca, b_ca, w1_sa, b1_sa, w2_sa, b2_sa):
    """Botblock_CA_SA2.forward(N, P).

    n_x : (B, C_in, H, W)      p_x : (B, C_out, H//2, W//2)
    w_conv3 : (C_out, C_in, 3, 3)                 -- conv3x3.weight (bias=False)
    w_ca : (C_out, C_out, 1, 1), b_ca : (C_out,)  -- channel_attention.conv1x1
    w1_sa/b1_sa/w2_sa/b2_sa : s_attention params (cannot affect the output: softmax over
        the size-1 channel axis is identically 1).
    Returns (B, C_out, H//2, W//2) float32.
    """
    f32, bf16 = jnp.float32, jnp.bfloat16
    B, C_in, H, W = n_x.shape
    C_out = w_conv3.shape[0]
    Ho = (H + 2 - 3) // 2 + 1
    Wo = (W + 2 - 3) // 2 + 1
    M = Ho * Wo
    K = 9 * C_in

    w3_flat_f32 = w_conv3.reshape(C_out, K).astype(f32)

    # ---------------------------------------------------------------------------
    # Channel-attention branch, hoisted to tiny XLA math (exact via linearity):
    #   mean_{HoWo}(conv3x3(N) + P) = w3 @ mean_{HoWo}(taps(N)) + mean_{HoWo}(P)
    # ---------------------------------------------------------------------------
    xpad_f32 = jnp.pad(n_x.astype(f32), ((0, 0), (0, 0), (1, 1), (1, 1)))
    tap_means = jnp.stack(
        [xpad_f32[:, :, dy:dy + 2 * Ho:2, dx:dx + 2 * Wo:2].mean(axis=(2, 3))
         for dy in range(3) for dx in range(3)], axis=2)            # (B, C_in, 9)
    tap_means = tap_means.reshape(B, K)                             # matches w3 flatten order
    p_mean = p_x.astype(f32).reshape(B, C_out, M).mean(axis=2)      # (B, C_out)
    pooled = tap_means @ w3_flat_f32.T + p_mean                     # (B, C_out)
    logits = pooled @ w_ca.reshape(C_out, C_out).astype(f32).T + b_ca.reshape(1, C_out)
    ca = jax.nn.softmax(logits, axis=1)                             # (B, C_out)
    scale = (1.0 + ca).astype(f32)                                  # folds "ca*out + out"

    # ---------------------------------------------------------------------------
    # Padded / bf16 operands for the main kernel (channel on sublane, pixel on lane).
    # ---------------------------------------------------------------------------
    Cp = _round_up(C_out, 8)
    Kp = _round_up(K, 8)
    TILE_M = min(512, _round_up(M, 128))      # 128-multiple lane-dense tiles, VMEM-bounded
    Mp = _round_up(M, TILE_M)

    # Stride-2 halo gather (im2col) of N, bf16.  Tap ordering (c_in, ky, kx) matches
    # w_conv3.reshape(C_out, C_in*9).  Marked fusible via allow_input_fusion below.
    xpad_bf = jnp.pad(n_x.astype(bf16), ((0, 0), (0, 0), (1, 1), (1, 1)))
    patches = jnp.stack(
        [xpad_bf[:, :, dy:dy + 2 * Ho:2, dx:dx + 2 * Wo:2]
         for dy in range(3) for dx in range(3)], axis=2)            # (B, C_in, 9, Ho, Wo)
    patches = patches.reshape(B, K, M)
    patches = jnp.pad(patches, ((0, 0), (0, Kp - K), (0, Mp - M)))  # (B, Kp, Mp)

    p_flat = p_x.astype(bf16).reshape(B, C_out, M)
    p_flat = jnp.pad(p_flat, ((0, 0), (0, Cp - C_out), (0, Mp - M)))      # (B, Cp, Mp)

    w3_flat = jnp.pad(w3_flat_f32, ((0, Cp - C_out), (0, Kp - K))).astype(bf16)  # (Cp, Kp)
    scale_in = jnp.pad(scale, ((0, 0), (0, Cp - C_out)))[:, :, None]             # (B, Cp, 1)

    grid = (B, Mp // TILE_M)
    out_flat = pl.pallas_call(
        _botblock_kernel,
        out_shape=jax.ShapeDtypeStruct((B, Cp, Mp), f32),
        grid=grid,
        in_specs=[
            pl.BlockSpec((1, Kp, TILE_M), lambda b, m: (b, 0, m)),   # im2col taps of N
            pl.BlockSpec((1, Cp, TILE_M), lambda b, m: (b, 0, m)),   # P
            pl.BlockSpec((1, Cp, 1),      lambda b, m: (b, 0, 0)),   # (1 + ca) per batch
            pl.BlockSpec((Cp, Kp),        lambda b, m: (0, 0)),      # conv3x3 weight
        ],
        out_specs=pl.BlockSpec((1, Cp, TILE_M), lambda b, m: (b, 0, m)),
        compiler_params=pltpu.CompilerParams(
            dimension_semantics=("parallel", "parallel"),
            vmem_limit_bytes=48 * 1024 * 1024,
            # Let XLA fuse the pad/slice/stack/reshape producers of patches / P into the
            # pallas_call instead of materializing them in HBM.
            allow_input_fusion=[True, True, False, False],
        ),
    )(patches, p_flat, scale_in, w3_flat)

    # Drop channel / pixel padding (no-op copies when C_out % 8 == 0 and M % TILE_M == 0).
    return out_flat[:, :C_out, :M].reshape(B, C_out, Ho, Wo)


def _reference(n_x, p_x, w_conv3, w_ca, b_ca, w1_sa, b1_sa, w2_sa, b2_sa):
    """Pure-JAX f32 reference, faithful to the PyTorch forward (incl. the SA softmax)."""
    hi = lax.Precision.HIGHEST
    C_out = w_conv3.shape[0]
    x = lax.conv_general_dilated(
        n_x, w_conv3, window_strides=(2, 2), padding=((1, 1), (1, 1)),
        dimension_numbers=("NCHW", "OIHW", "NCHW"), precision=hi)
    out = x + p_x
    pooled = jnp.mean(out, axis=(2, 3), keepdims=True)
    logits = jnp.einsum("oc,bcij->boij", w_ca.reshape(C_out, C_out), pooled,
                        precision=hi) + b_ca.reshape(1, C_out, 1, 1)
    ca = jax.nn.softmax(logits, axis=1)
    ca_out = ca * out + out
    y = jnp.einsum("c,bchw->bhw", w1_sa.reshape(-1), ca_out,
                   precision=hi)[:, None, :, :] + b1_sa
    y = y * w2_sa + b2_sa
    sa = jax.nn.softmax(y, axis=1)          # channel axis of size 1 -> all ones
    return sa * ca_out


if __name__ == "__main__":
    key = jax.random.PRNGKey(0)
    ks = jax.random.split(key, 9)

    # in_planes must equal out_planes for the module's forward to be shape-consistent.
    B, C_in, C_out, H, W = 2, 4, 4, 16, 16
    Ho, Wo = H // 2, W // 2

    n_x = jax.random.normal(ks[0], (B, C_in, H, W), jnp.float32)
    p_x = jax.random.normal(ks[1], (B, C_out, Ho, Wo), jnp.float32)

    w_conv3 = jax.random.normal(ks[2], (C_out, C_in, 3, 3), jnp.float32) * 0.2   # conv3x3.weight
    w_ca = jax.random.normal(ks[3], (C_out, C_out, 1, 1), jnp.float32) * 0.2     # channel_attention.conv1x1.weight
    b_ca = jax.random.normal(ks[4], (C_out,), jnp.float32) * 0.1                 # channel_attention.conv1x1.bias
    w1_sa = jax.random.normal(ks[5], (1, C_out, 1, 1), jnp.float32) * 0.1        # s_attention.conv_to_1.weight
    b1_sa = (jax.random.normal(ks[6], (1,), jnp.float32) * 0.1)[0]               # s_attention.conv_to_1.bias
    w2_sa = jax.random.normal(ks[7], (1, 1, 1, 1), jnp.float32)[0, 0, 0, 0]      # s_attention.conv1x1.weight
    b2_sa = (jax.random.normal(ks[8], (1,), jnp.float32) * 0.1)[0]               # s_attention.conv1x1.bias

    out = botblock_ca_sa2(n_x, p_x, w_conv3, w_ca, b_ca, w1_sa, b1_sa, w2_sa, b2_sa)
    out = jax.block_until_ready(out)

    ref = _reference(n_x, p_x, w_conv3, w_ca, b_ca, w1_sa, b1_sa, w2_sa, b2_sa)
    assert out.shape == (B, C_out, Ho, Wo)
    # Tolerance loosened vs the previous f32 version because the main conv path now runs
    # with bf16 inputs (f32 accumulation), per the performance feedback.
    assert jnp.allclose(out, ref, atol=5e-2, rtol=5e-2), (
        f"max abs err {jnp.max(jnp.abs(out - ref))}")
    print("KERNEL_OK")
</pallas_src>

<mosaic_0001>
module attributes {stable_mosaic.version = 11 : i64} {
  func.func @_botblock_kernel(%arg0: i32, %arg1: i32, %arg2: memref<1x40x128xbf16, #tpu.memory_space<vmem>>, %arg3: memref<1x8x128xbf16, #tpu.memory_space<vmem>>, %arg4: memref<1x8x1xf32, #tpu.memory_space<vmem>>, %arg5: memref<8x40xbf16, #tpu.memory_space<vmem>>, %arg6: memref<1x8x128xf32, #tpu.memory_space<vmem>>) attributes {dimension_semantics = [#tpu.dimension_semantics<parallel>, #tpu.dimension_semantics<parallel>], iteration_bounds = array<i64: 2, 1>, scalar_prefetch = 0 : i64, scratch_operands = 0 : i64, tpu.core_type = #tpu.core_type<tc>, window_params = [{transform_indices = @transform_0, window_bounds = array<i64: 1, 40, 128>}, {transform_indices = @transform_1, window_bounds = array<i64: 1, 8, 128>}, {transform_indices = @transform_2, window_bounds = array<i64: 1, 8, 1>}, {pipeline_mode = #tpu.pipeline_mode<synchronous>, transform_indices = @transform_3, window_bounds = array<i64: 8, 40>}, {transform_indices = @transform_4, window_bounds = array<i64: 1, 8, 128>}]} {
    %c0 = arith.constant 0 : index
    %c0_0 = arith.constant 0 : index
    %0 = vector.load %arg5[%c0, %c0_0] : memref<8x40xbf16, #tpu.memory_space<vmem>>, vector<8x40xbf16>
    %c0_1 = arith.constant 0 : index
    %c0_2 = arith.constant 0 : index
    %c0_3 = arith.constant 0 : index
    %1 = vector.load %arg2[%c0_1, %c0_2, %c0_3] : memref<1x40x128xbf16, #tpu.memory_space<vmem>>, vector<1x40x128xbf16>
    %2 = vector.shape_cast %1 : vector<1x40x128xbf16> to vector<40x128xbf16>
    %cst = arith.constant dense<0.000000e+00> : vector<8x128xf32>
    %3 = tpu.matmul %0, %2, %cst {dimension_numbers = #tpu.dot_dimension_numbers<[1], [0], [0], [1], [0, 0, 1, 1], [], []>} : vector<8x40xbf16>, vector<40x128xbf16>, vector<8x128xf32> -> vector<8x128xf32>
    %c0_4 = arith.constant 0 : index
    %c0_5 = arith.constant 0 : index
    %c0_6 = arith.constant 0 : index
    %4 = vector.load %arg3[%c0_4, %c0_5, %c0_6] : memref<1x8x128xbf16, #tpu.memory_space<vmem>>, vector<1x8x128xbf16>
    %5 = vector.shape_cast %4 : vector<1x8x128xbf16> to vector<8x128xbf16>
    %6 = arith.extf %5 : vector<8x128xbf16> to vector<8x128xf32>
    %7 = arith.addf %3, %6 : vector<8x128xf32>
    %c0_7 = arith.constant 0 : index
    %c0_8 = arith.constant 0 : index
    %c0_9 = arith.constant 0 : index
    %8 = vector.load %arg4[%c0_7, %c0_8, %c0_9] : memref<1x8x1xf32, #tpu.memory_space<vmem>>, vector<1x8x1xf32>
    %9 = vector.shape_cast %8 : vector<1x8x1xf32> to vector<8x1xf32>
    %10 = vector.broadcast %9 : vector<8x1xf32> to vector<8x128xf32>
    %11 = arith.mulf %10, %7 : vector<8x128xf32>
    %c0_10 = arith.constant 0 : index
    %c0_11 = arith.constant 0 : index
    %c0_12 = arith.constant 0 : index
    %12 = vector.load %arg6[%c0_10, %c0_11, %c0_12] : memref<1x8x128xf32, #tpu.memory_space<vmem>>, vector<1x8x128xf32>
    %13 = vector.shape_cast %12 : vector<1x8x128xf32> to vector<8x128xf32>
    %14 = vector.shape_cast %11 : vector<8x128xf32> to vector<1x8x128xf32>
    tpu.vector_store %arg6[%c0_10, %c0_11, %c0_12], %14 {strides = array<i32>} : memref<1x8x128xf32, #tpu.memory_space<vmem>>, vector<1x8x128xf32>,
    return
  }
  func.func @transform_0(%arg0: i32, %arg1: i32) -> (i32, i32, i32) {
    %c0_i32 = arith.constant 0 : i32
    %c0_i32_0 = arith.constant 0 : i32
    return %arg0, %c0_i32, %arg1 : i32, i32, i32
  }
  func.func @transform_1(%arg0: i32, %arg1: i32) -> (i32, i32, i32) {
    %c0_i32 = arith.constant 0 : i32
    %c0_i32_0 = arith.constant 0 : i32
    return %arg0, %c0_i32, %arg1 : i32, i32, i32
  }
  func.func @transform_2(%arg0: i32, %arg1: i32) -> (i32, i32, i32) {
    %c0_i32 = arith.constant 0 : i32
    %c0_i32_0 = arith.constant 0 : i32
    %c0_i32_1 = arith.constant 0 : i32
    return %arg0, %c0_i32, %c0_i32_0 : i32, i32, i32
  }
  func.func @transform_3(%arg0: i32, %arg1: i32) -> (i32, i32) {
    %c0_i32 = arith.constant 0 : i32
    %c0_i32_0 = arith.constant 0 : i32
    %c0_i32_1 = arith.constant 0 : i32
    return %c0_i32, %c0_i32_0 : i32, i32
  }
  func.func @transform_4(%arg0: i32, %arg1: i32) -> (i32, i32, i32) {
    %c0_i32 = arith.constant 0 : i32
    %c0_i32_0 = arith.constant 0 : i32
    return %arg0, %c0_i32, %arg1 : i32, i32, i32
  }
}

</mosaic_0001>

<bundles_post_ra>
// kernel: botblock_ca_sa2.2
= control target key start
LH: loop header
LB: loop body
LE: loop exit
PB: predicated region body
PF: predicated region fallthrough
CT: control target
= control target key end

     0   :  { %s789_s20 = smov 0   ;;  %s791_s21 = smov 0   ;;  %s854_s0 = inlined_call_operand.vmem [shape: f32[2,8,1], index: 0, kind: input, shape index: {}]   ;;  %s855_s1 = inlined_call_operand.vmem [shape: bf16[8,40], index: 1, kind: input, shape index: {}]   ;;  %s856_s2 = inlined_call_operand.vmem [shape: bf16[2,36,64], index: 2, kind: input, shape index: {}]   ;;  %s857_s3 = inlined_call_operand.<no memory space> [shape: bf16[], index: 3, kind: input, shape index: {}]   ;;  %s858_s4 = inlined_call_operand.vmem [shape: bf16[2,4,64], index: 4, kind: input, shape index: {}]   ;;  %s859_s5 = inlined_call_operand.vmem [shape: f32[2,8,128], index: 5, kind: output, shape index: {}]  }
   0x1   :  { %v10_v0 = vstv %s857_s3  ;;  %s793_s22 = smov 0  }
   0x2   :  { %v787_v1 = vunpack.i.l.bf16 %v10_v0 }
   0x3 LB: > { %s37_s3 = sadd.s32 1, %s747_s21  ;;  %p680_p0 = scmp.ge.s32.totalorder %s751_s22, 1  ;;  %s751_s22 = sphi %s793_s22, %s25_s22   ;;  %s747_s21 = sphi %s791_s21, %s861_s21   ;;  %s743_s20 = sphi %s789_s20, %s860_s20  }
   0x4   : > { %p39_p1 = scmp.ge.s32.totalorder %s37_s3, 2  ;;  %p223_p2 = scmp.lt.s32.totalorder %s751_s22, 3 }
   0x6   : > { %s863_s3 = smov (%p39_p1, %s37_s3), 0  ;;  %p224_p3 = pnand %p680_p0, %p223_p2 }
   0x8   : > { %227 = sbr.rel (%p224_p3) target bundleno = 184 (0xb8), region = 36 }
   0xd   : > { %p271_p4 = scmp.lt.s32.totalorder %s743_s20, 1  ;;  %v328_v2 = vlaneseq  ;;  %v753_v10 = vmov 0   ;;  %vm547_vm3 = vcmask 1043456   ;;  %v520_v38 = vld [vmem:[%s855_s1] sm:$0xf]  ;;  %vm543_vm4 = vcmask 326656  }
   0xe   : > { %728 = vset.pattern.permute.xlu0 %v753_v10 }
   0xf   : > { %s865_s20 = smov (!%p271_p4, %s743_s20), 1  ;;  %v470_v3 = vshrl.u32 %v328_v2, 7  ;;  %v329_v4 = vand.u32 127, %v328_v2 }
  0x10   : > { %s702_s23 = smul.u32 20, %s865_s20  ;;  %s683_s24 = sshll.u32 %s865_s20, 3 }
  0x11   : > { %v471_v5 = vadd.s32 32, %v470_v3  ;;  %s295_s27 = scalar_lea.vmem %s854_s0, %s683_s24  ;;  %s682_s6 = sshll.u32 %s865_s20, 1  ;;  %vm332_vm0 = vcmp.lt.s32.totalorder %v329_v4, 64  ;;  %vm506_vm2 = vcmp.lt.s32.totalorder %v470_v3, 4 }
  0x12   : > { %s278_s30 = scalar_lea.vmem %s856_s2, %s702_s23  ;;  %v564_v6 = vld [vmem:[%s295_s27] sm:$0xff]  ;;  %s289_s9 = scalar_lea.vmem %s858_s4, %s682_s6 }
  0x13   : > { %v688_v7 = vld [vmem:[%s278_s30 + $0x10] sm:$0xf]  ;;  %vm472_vm1 = vcmp.lt.s32.totalorder %v471_v5, 36  ;;  %v686_v8 = vld [vmem:[%s278_s30 + $0x8] sm:$0xff]   ;;  %v315_v9 = vld [vmem:[%s278_s30] sm:$0xff]   ;;  %567 = vperm.xlu0 %728, %v564_v6   ;;  %s302_s14 = scalar_lea.vmem %s859_s5, %s683_s24 }
  0x14   : > { %v463_v11 = vunpack.c.l.bf16 %v688_v7  ;;  %v389_v12 = vunpack.c.l.bf16 %v686_v8  ;;  %v426_v13 = vunpack.c.h.bf16 %v686_v8  ;;  %v316_v14 = vunpack.c.l.bf16 %v315_v9  ;;  %v496_v15 = vld [vmem:[%s289_s9] sm:$0x3] }
  0x15   : > { %v352_v16 = vunpack.c.h.bf16 %v315_v9  ;;  %v497_v17 = vunpack.c.l.bf16 %v496_v15 }
  0x16   : > { %v473_v18 = vsel %vm472_vm1, %v463_v11, %v787_v1  ;;  %v406_v19 = vsel %vm332_vm0, %v389_v12, %v787_v1  ;;  %v443_v20 = vsel %vm332_vm0, %v426_v13, %v787_v1  ;;  %v333_v21 = vsel %vm332_vm0, %v316_v14, %v787_v1 }
  0x17   : > { %v480_v22 = vsel %vm332_vm0, %v473_v18, %v787_v1  ;;  %v408_v23 = vpack.c.bf16 0.0, %v406_v19  ;;  %v445_v24 = vpack.c.bf16 0.0, %v443_v20  ;;  %v334_v26 = vpack.c.bf16 0.0, %v333_v21 }
  0x18   : > { %v482_v25 = vpack.c.bf16 0.0, %v480_v22  ;;  %v369_v27 = vsel %vm332_vm0, %v352_v16, %v787_v1  ;;  %v507_v28 = vsel %vm506_vm2, %v497_v17, %v787_v1 }
  0x19   : > { %411 = vst [vmem:[#allocation12 + $0x8] sm:$0xf] %v408_v23  ;;  %v371_v29 = vpack.c.bf16 0.0, %v369_v27  ;;  %v514_v30 = vsel %vm332_vm0, %v507_v28, %v787_v1 }
  0x1a   : > { %485 = vst [vmem:[#allocation12 + $0x10] sm:$0xf] %v482_v25  ;;  %v515_v31 = vpack.c.bf16 0.0, %v514_v30 }
  0x1b   : > { %448 = vst [vmem:[#allocation12 + $0xc] sm:$0xf] %v445_v24 }
  0x1c   : > { %337 = vst [vmem:[#allocation12] sm:$0xf] %v334_v26 }
  0x1d   : > { %374 = vst [vmem:[#allocation12 + $0x4] sm:$0xf] %v371_v29 }
  0x1e   : > { %518 = vst [vmem:[#allocation13] sm:$0xf] %v515_v31 }
  0x21   : > { %v525_v32 = vld [vmem:[#allocation12 + $0x10] sm:$0xf] }
  0x22   : > { %v537_v33 = vunpack.c.l.b16 %v525_v32  ;;  %v701_v36 = vld [vmem:[#allocation12 + $0x8] sm:$0xff] }
  0x24   : > { %v540_v34 = vpack.c.b16 %v537_v33, %v537_v33  ;;  %v700_v37 = vld [vmem:[#allocation12] sm:$0xff] }
  0x25   : > { %v526_v39 = vld [vmem:[#allocation13] sm:$0xf] }
  0x26   : > { %v549_v35 = vsel %vm547_vm3, %v540_v34, 0  ;;  %v527_v40 = vunpack.c.l.bf16 %v526_v39 }
  0x27   : > { %556 = vmatpush.bf16.msra.mxu0 %v549_v35 }
  0x2b   : > { %557 = vmatpush.bf16.msra.mxu0 %v701_v36 }
  0x2f   : > { %558 = vmatpush.bf16.msra.mxu0 %v700_v37 }
  0x32   : > { %697 = vmatmul.msk.bf16.vlgmr.msra.gmra.mxu0 %vm543_vm4, %v520_v38 }
  0x85   : > { %v568_v42 = vpop.permute.xlu0 %567 }
  0xaf   : > { %v560_v41 = vpop.f32.mrf.mxu0 }
  0xb0   : > { %v561_v43 = vadd.f32 %v560_v41, %v527_v40 }
  0xb2   : > { %v570_v44 = vmul.f32 %v568_v42, %v561_v43 }
  0xb4   : > { %571 = vst [vmem:[%s302_s14] sm:$0xff] %v570_v44 }
  0xb7   : > { %v562_v45 = vpop.f32.mrf.mxu0 }
  0xb8 PF: > { %s25_s22 = sadd.s32 1, %s751_s22   ;;  %s860_s20 = smov %s747_s21 }
  0xb9   : > { %p22_p5 = scmp.ge.s32.totalorder %s25_s22, 4   ;;  %s861_s21 = smov %s863_s3 }
  0xbb   :  { %24 = sbr.rel (!%p22_p5) target bundleno = 3 (0x3), region = 80 }

</bundles_post_ra>
